<compile_context>
chip_gen: v6e
topology: v6e:2x2x1
jax: 0.10.0
libtpu: 0.0.40
codegen_flags: <defaults>
</compile_context>

<pallas_src>
import jax
import jax.numpy as jnp
from jax.experimental import pallas as pl
from jax.experimental.pallas import tpu as pltpu

_LANE = 1024                   # lane-dense last dim (multiple of 128) -> unmasked full-vreg stores
_TARGET_BLOCK_BYTES = 4 << 20  # ~4 MiB per block per buffer


def _scaling_offset_kernel(params_ref, x_ref, o_ref):
    # params_ref: (2,) f32 in SMEM -> [scaling, offset]
    scaling = params_ref[0]
    offset = params_ref[1]
    x = x_ref[...]
    # Compute in f32 on the VPU (op is memory-bound; this is free), cast back.
    o_ref[...] = (scaling * x.astype(jnp.float32) + offset).astype(o_ref.dtype)


def _block_rows_for(dtype, rows: int) -> int:
    itemsize = dtype.itemsize
    # ~4 MiB per block, rounded down to a multiple of 32 sublanes so the block
    # shape is legal for f32 (8), bf16 (16) and int8/fp8 (32) packing.
    max_rows = max(32, (_TARGET_BLOCK_BYTES // (_LANE * itemsize)) // 32 * 32)
    if rows <= max_rows:
        # Single block whose last two dims equal the full array dims -> always legal.
        return rows
    # Grid masks the final partial block; no row padding needed.
    return max_rows


def _scaling_offset_2d(x2d, params):
    rows, lane = x2d.shape
    block_rows = _block_rows_for(x2d.dtype, rows)
    grid = (pl.cdiv(rows, block_rows),)
    return pl.pallas_call(
        _scaling_offset_kernel,
        out_shape=jax.ShapeDtypeStruct((rows, lane), x2d.dtype),
        grid_spec=pltpu.PrefetchScalarGridSpec(
            num_scalar_prefetch=0,
            grid=grid,
            in_specs=[
                pl.BlockSpec(memory_space=pltpu.MemorySpace.SMEM),      # [scaling, offset]
                pl.BlockSpec((block_rows, lane), lambda i: (i, 0)),
            ],
            out_specs=pl.BlockSpec((block_rows, lane), lambda i: (i, 0)),
        ),
        compiler_params=pltpu.CompilerParams(
            dimension_semantics=("parallel",),
            vmem_limit_bytes=48 << 20,
        ),
    )(params, x2d)


def scaling_and_offset(in_tensor, scaling=1.0, offset=0.0):
    """Pallas implementation of ScalingAndOffset.forward.

    in_tensor: [*bs, in_dim]  (any number of leading batch dims)
    returns:   same shape/dtype, scaling * x + offset
    """
    orig_shape = in_tensor.shape
    orig_dtype = in_tensor.dtype
    total = in_tensor.size

    params = jnp.asarray([scaling, offset], dtype=jnp.float32)

    # Tiny inputs (< one lane-dense row): launch overhead dominates and XLA
    # fuses a*x+b for free -> skip Pallas entirely.
    if total < _LANE:
        return (params[0] * in_tensor.astype(jnp.float32) + params[1]).astype(orig_dtype)

    # Elementwise => layout free. Flatten and re-view lane-dense as (rows, 1024).
    flat = in_tensor.reshape(-1)
    rows = total // _LANE
    main = rows * _LANE

    out_main = _scaling_offset_2d(flat[:main].reshape(rows, _LANE), params).reshape(-1)

    tail = total - main
    if tail:
        # Handle the <1024-element remainder in plain JAX instead of padding the
        # whole array and slicing it back (saves two full-array HBM round trips).
        tail_out = (params[0] * flat[main:].astype(jnp.float32) + params[1]).astype(orig_dtype)
        out_main = jnp.concatenate([out_main, tail_out])

    return out_main.reshape(orig_shape)


if __name__ == "__main__":
    # Module config (deterministic, in-script): in_dim=32, scaling=2.5, offset=-0.75
    in_dim = 32
    scaling = 2.5
    offset = -0.75

    key = jax.random.PRNGKey(0)
    k1, k2, k3, k4, k5 = jax.random.split(key, 5)

    # Main demo: *bs = (2, 8, 16), last dim = in_dim -> total = 8192 (lane-aligned).
    x = jax.random.normal(k1, (2, 8, 16, in_dim), dtype=jnp.float32)
    out = jax.block_until_ready(scaling_and_offset(x, scaling=scaling, offset=offset))
    assert out.shape == x.shape and out.dtype == x.dtype
    assert jnp.allclose(out, scaling * x + offset, atol=1e-6, rtol=1e-6)

    # Unaligned total >= 1 row: exercises kernel prefix + plain-JAX tail path.
    x2 = jax.random.normal(k2, (70, 33, in_dim), dtype=jnp.float32)
    out2 = jax.block_until_ready(scaling_and_offset(x2, scaling=scaling, offset=offset))
    assert out2.shape == x2.shape and out2.dtype == x2.dtype
    assert jnp.allclose(out2, scaling * x2 + offset, atol=1e-6, rtol=1e-6)

    # Multi-block grid with masked partial last block (rows=1050 > block_rows=1024).
    x3 = jax.random.normal(k3, (2100, 512), dtype=jnp.float32)
    out3 = jax.block_until_ready(scaling_and_offset(x3, scaling=scaling, offset=offset))
    assert jnp.allclose(out3, scaling * x3 + offset, atol=1e-6, rtol=1e-6)

    # Tiny input: plain-JAX fast path.
    x4 = jax.random.normal(k4, (3, 5, in_dim), dtype=jnp.float32)
    out4 = jax.block_until_ready(scaling_and_offset(x4, scaling=scaling, offset=offset))
    assert jnp.allclose(out4, scaling * x4 + offset, atol=1e-6, rtol=1e-6)

    # bf16 input: dtype-aware block sizing / cast-back path.
    x5 = jax.random.normal(k5, (4, 32, in_dim), dtype=jnp.bfloat16)
    out5 = jax.block_until_ready(scaling_and_offset(x5, scaling=scaling, offset=offset))
    assert out5.dtype == jnp.bfloat16 and out5.shape == x5.shape
    assert jnp.allclose(out5.astype(jnp.float32),
                        scaling * x5.astype(jnp.float32) + offset,
                        atol=2e-2, rtol=2e-2)

    print("KERNEL_OK")
</pallas_src>

<mosaic_0001>
module attributes {stable_mosaic.version = 11 : i64} {
  func.func @_scaling_offset_kernel(%arg0: i32, %arg1: memref<2xf32, #tpu.memory_space<smem>>, %arg2: memref<8x1024xf32, #tpu.memory_space<vmem>>, %arg3: memref<8x1024xf32, #tpu.memory_space<vmem>>) attributes {dimension_semantics = [#tpu.dimension_semantics<parallel>], iteration_bounds = array<i64: 1>, scalar_prefetch = 0 : i64, scratch_operands = 0 : i64, tpu.core_type = #tpu.core_type<tc>, window_params = [{transform_indices = @transform_0, window_bounds = array<i64: 2>}, {transform_indices = @transform_1, window_bounds = array<i64: 8, 1024>}, {transform_indices = @transform_2, window_bounds = array<i64: 8, 1024>}]} {
    %c0 = arith.constant 0 : index
    %0 = memref.load %arg1[%c0] : memref<2xf32, #tpu.memory_space<smem>>
    %c1 = arith.constant 1 : index
    %1 = memref.load %arg1[%c1] : memref<2xf32, #tpu.memory_space<smem>>
    %c0_0 = arith.constant 0 : index
    %c0_1 = arith.constant 0 : index
    %2 = vector.load %arg2[%c0_0, %c0_1] : memref<8x1024xf32, #tpu.memory_space<vmem>>, vector<8x1024xf32>
    %3 = vector.broadcast %0 : f32 to vector<8x1024xf32>
    %4 = arith.mulf %3, %2 : vector<8x1024xf32>
    %5 = vector.broadcast %1 : f32 to vector<8x1024xf32>
    %6 = arith.addf %4, %5 : vector<8x1024xf32>
    %c0_2 = arith.constant 0 : index
    %c0_3 = arith.constant 0 : index
    %7 = vector.load %arg3[%c0_2, %c0_3] : memref<8x1024xf32, #tpu.memory_space<vmem>>, vector<8x1024xf32>
    tpu.vector_store %arg3[%c0_2, %c0_3], %6 {strides = array<i32>} : memref<8x1024xf32, #tpu.memory_space<vmem>>, vector<8x1024xf32>,
    return
  }
  func.func @transform_0(%arg0: i32) -> i32 {
    %c0_i32 = arith.constant 0 : i32
    %c0_i32_0 = arith.constant 0 : i32
    return %c0_i32 : i32
  }
  func.func @transform_1(%arg0: i32) -> (i32, i32) {
    %c0_i32 = arith.constant 0 : i32
    %c0_i32_0 = arith.constant 0 : i32
    return %arg0, %c0_i32 : i32, i32
  }
  func.func @transform_2(%arg0: i32) -> (i32, i32) {
    %c0_i32 = arith.constant 0 : i32
    %c0_i32_0 = arith.constant 0 : i32
    return %arg0, %c0_i32 : i32, i32
  }
}

</mosaic_0001>

<bundles_post_ra>
// kernel: tpu_custom_call.1
= control target key start
LH: loop header
LB: loop body
LE: loop exit
PB: predicated region body
PF: predicated region fallthrough
CT: control target
= control target key end

     0   :  { %7 = vsyncpa [#allocation5], 0  ;;  %s172_s0 = inlined_call_operand.hbm [shape: f32[2], index: 0, kind: input, shape index: {}]   ;;  %s173_s1 = inlined_call_operand.hbm [shape: f32[8,1024], index: 1, kind: input, shape index: {}]   ;;  %s174_s2 = inlined_call_operand.hbm [shape: f32[8,1024], index: 2, kind: output, shape index: {}]  }
   0x1   :  { %8 = vsyncpa [#allocation3], 0 }
   0x2   :  { %9 = vsyncpa [#allocation4], 0  ;;  %s145_s9 = smov [#allocation2]   ;;  %s146_s12 = smov [#allocation6]  }
   0x3   :  { %17 = dma.hbm_to_smem %s172_s0, 16, %s145_s9, [#allocation5]  }
   0x4   :  { %s24_s13 = sshll.u32 %s146_s12, 4  ;;  %s25_s13 = int_to_ptr.vmem [resolvable:$true] %s24_s13 }
   0x5   :  { %s107_s14 = scalar_lea.vmem %s25_s13, 1024  ;;  %p112_p1 = scmp.lt.s32.totalorder %s25_s13, %s25_s13 }
   0x6   :  { %p108_p0 = scmp.ne.s32.totalorder %s25_s13, %s107_s14  ;;  %p113_p2 = scmp.lt.s32.totalorder %s107_s14, %s107_s14 }
   0x8   :  { %p114_p3 = por %p113_p2, %p112_p1 }
   0xa   :  { %p115_p4 = pnand %p114_p3, %p108_p0 }
   0xc   :  { %118 = shalt.err (!%p115_p4)
}
   0xd   :  { %27 = dma.hbm_to_vmem [thread:$0]  %s173_s1, 1024, %s25_s13, [#allocation3]  }
   0xe   :  { %139 = dma.done.wait [#allocation5], 16  }
   0xf   :  { %140 = vsyncadd [#allocation5], 4294967280 }
  0x10   :  { %141 = dma.done.wait [#allocation3], 1024  }
  0x11   :  { %142 = vsyncadd [#allocation3], 4294966272 }
  0x12   :  { %34 = sfence }
  0x13   :  { %s35_s0 = sld [smem:[#allocation2]]  ;;  %v37_v0 = vld [vmem:[#allocation6] sm:$0xff]  ;;  %v38_v1 = vld [vmem:[#allocation6 + $0x8] sm:$0xff]  ;;  %v39_v2 = vld [vmem:[#allocation6 + $0x10] sm:$0xff]  ;;  %s147_s1 = smov [#allocation7]  }
  0x14   :  { %s87_s17 = sld [smem:[#allocation2 + $0x1]]  ;;  %v40_v3 = vld [vmem:[#allocation6 + $0x18] sm:$0xff]  ;;  %v41_v4 = vld [vmem:[#allocation6 + $0x20] sm:$0xff]  ;;  %v42_v5 = vld [vmem:[#allocation6 + $0x28] sm:$0xff]  ;;  %s77_s18 = sshll.u32 %s147_s1, 4  ;;  %s78_s18 = int_to_ptr.vmem [resolvable:$true] %s77_s18 }
  0x15   :  { %v43_v6 = vld [vmem:[#allocation6 + $0x30] sm:$0xff]  ;;  %v44_v8 = vld [vmem:[#allocation6 + $0x38] sm:$0xff]  ;;  %s119_s19 = scalar_lea.vmem %s78_s18, 1024  ;;  %p124_p6 = scmp.lt.s32.totalorder %s78_s18, %s78_s18 }
  0x16   :  { %p120_p5 = scmp.ne.s32.totalorder %s78_s18, %s119_s19  ;;  %p125_p7 = scmp.lt.s32.totalorder %s119_s19, %s119_s19 }
  0x18   :  { %p126_p8 = por %p125_p7, %p124_p6 }
  0x19   :  { %v45_v7 = vstv %s35_s0 }
  0x1a   :  { %v46_v9 = vmul.f32 %v45_v7, %v37_v0  ;;  %v54_v10 = vstv %s87_s17  ;;  %v47_v11 = vmul.f32 %v45_v7, %v38_v1  ;;  %v48_v12 = vmul.f32 %v45_v7, %v39_v2  ;;  %p127_p9 = pnand %p126_p8, %p120_p5 }
  0x1b   :  { %v49_v13 = vmul.f32 %v45_v7, %v40_v3  ;;  %v50_v14 = vmul.f32 %v45_v7, %v41_v4  ;;  %v51_v15 = vmul.f32 %v45_v7, %v42_v5  ;;  %v52_v16 = vmul.f32 %v45_v7, %v43_v6 }
  0x1c   :  { %v55_v17 = vadd.f32 %v54_v10, %v46_v9  ;;  %v56_v18 = vadd.f32 %v54_v10, %v47_v11  ;;  %v57_v19 = vadd.f32 %v54_v10, %v48_v12  ;;  %v53_v20 = vmul.f32 %v45_v7, %v44_v8 }
  0x1d   :  { %v58_v21 = vadd.f32 %v54_v10, %v49_v13  ;;  %v59_v22 = vadd.f32 %v54_v10, %v50_v14  ;;  %v60_v23 = vadd.f32 %v54_v10, %v51_v15  ;;  %v61_v24 = vadd.f32 %v54_v10, %v52_v16 }
  0x1e   :  { %63 = vst [vmem:[#allocation7] sm:$0xff] %v55_v17  ;;  %64 = vst [vmem:[#allocation7 + $0x8] sm:$0xff] %v56_v18  ;;  %v62_v25 = vadd.f32 %v54_v10, %v53_v20 }
  0x1f   :  { %65 = vst [vmem:[#allocation7 + $0x10] sm:$0xff] %v57_v19  ;;  %66 = vst [vmem:[#allocation7 + $0x18] sm:$0xff] %v58_v21 }
  0x20   :  { %67 = vst [vmem:[#allocation7 + $0x20] sm:$0xff] %v59_v22  ;;  %68 = vst [vmem:[#allocation7 + $0x28] sm:$0xff] %v60_v23 }
  0x21   :  { %69 = vst [vmem:[#allocation7 + $0x30] sm:$0xff] %v61_v24  ;;  %70 = vst [vmem:[#allocation7 + $0x38] sm:$0xff] %v62_v25 }
  0x22   :  { %130 = shalt.err (!%p127_p9)
}
  0x23   :  { %80 = dma.vmem_to_hbm [thread:$0]  %s78_s18, 1024, %s174_s2, [#allocation4]  }
  0x24   :  { %143 = dma.done.wait [#allocation4], 1024  }
  0x25   :  { %144 = vsyncadd [#allocation4], 4294966272 }
  0x26   :  { %84 = vsyncpa [#allocation3], 1 }
  0x27   :  { %85 = vsyncpa [#allocation4], 1 }
  0x28   :  { %86 = vsyncpa [#allocation5], 1 }

</bundles_post_ra>
